<compile_context>
chip_gen: v5e
topology: v5e:2x2
jax: 0.10.0
libtpu: 0.0.40
codegen_flags: <defaults>
</compile_context>

<pallas_src>
import jax
import jax.numpy as jnp
from jax.experimental import pallas as pl
from jax.experimental.pallas import tpu as pltpu


_MAX_BATCH_TILE = 512     # ~5 MiB/step VMEM footprint -> safe on v5e / v6e / v7x
_SINGLE_STEP_MAX_B = 128  # below this, per-step overhead dominates; one grid step


def _round_up(x, m):
    return (x + m - 1) // m * m


def _attention_kernel(x_ref, wblk_ref, bblk_ref, vblk_ref, rrep_ref, ksum_ref,
                      out_ref, alphas_ref):
    # x_ref:      (TB, S*D)  lane-dense packed batch tile
    # wblk_ref:   (S*D, S*Q) kron(I_S, W)        (x.dtype)
    # bblk_ref:   (1, S*Q)   bias tiled over S   (f32)
    # vblk_ref:   (S*Q, S)   kron(I_S, v[:,None]) (f32)
    # rrep_ref:   (S, S*D)   kron(I_S, ones(1,D)) (f32)  alpha broadcast
    # ksum_ref:   (S*D, D)   kron(ones(S,1), I_D) (f32)  sum over S
    xp = x_ref[...]                                                    # (TB, S*D)

    # FFNN (tanh): one lane-dense MXU matmul; q[b, s*Q+j] = tanh(x[b,s,:] @ W[:,j] + b[j]).
    q = jnp.tanh(
        jnp.dot(xp, wblk_ref[...], preferred_element_type=jnp.float32)
        + bblk_ref[...].astype(jnp.float32)
    )                                                                  # (TB, S*Q) f32

    # Dot-product scores against the learned query vector (block-diagonal => per-s dot).
    scores = jnp.dot(q, vblk_ref[...], preferred_element_type=jnp.float32)  # (TB, S)

    # Softmax over the sequence axis (mask=None path of DotProductAttention).
    m = jnp.max(scores, axis=-1, keepdims=True)
    e = jnp.exp(scores - m)
    denom = jnp.sum(e, axis=-1, keepdims=True)
    alphas = e * pl.reciprocal(denom, approx=False)   # exact: keeps the 1e-5 tolerance

    # Weighted sum  out[b,d] = sum_s alphas[b,s] * x[b,s,d]:
    #   arep = alphas @ Rrep         (broadcast each alpha over its D lanes)
    #   out  = (arep * xp) @ Ksum    (sum the S groups)
    # Rrep/Ksum are 0/1 matrices, so the MXU multiplies are exact; the only large
    # temporary is the dense (TB, S*D) f32 product (no lane padding).
    arep = jnp.dot(alphas, rrep_ref[...], preferred_element_type=jnp.float32)   # (TB, S*D)
    out = jnp.dot(arep * xp, ksum_ref[...], preferred_element_type=jnp.float32)  # (TB, D)

    out_ref[...] = out.astype(out_ref.dtype)
    alphas_ref[...] = alphas.astype(alphas_ref.dtype)
    # TODO(synk): matrix_mask (masked softmax) and dropout>0 paths are not implemented
    # (module is exercised with mask=None, p=0.0 -> identity).


def _choose_batch_tile(B):
    if B <= _SINGLE_STEP_MAX_B:
        return B
    # At least 2 grid steps so v7x's two TensorCores can split the "parallel"
    # batch axis; capped so VMEM stays bounded on v5e / v7x.
    return min(_MAX_BATCH_TILE, _round_up(pl.cdiv(B, 2), 8))


def _vmem_limit_bytes(tb, S, D, Q, x_itemsize):
    """Real (lane-padded) per-step VMEM budget with headroom."""
    f32 = 4
    sd = S * D                           # packed x row width (lane-dense)
    sq = _round_up(S * Q, 128)           # q row (lane-padded)
    s_lanes = 128                        # scores/alphas rows (lane-padded)
    d_lanes = _round_up(D, 128)          # out rows (lane-padded)
    per_row = (
        2 * sd * x_itemsize              # x tile, double-buffered
        + sq * f32                       # q
        + 3 * s_lanes * f32              # scores / exp / alphas
        + 2 * sd * f32                   # arep + (arep * x) product
        + 2 * (d_lanes + s_lanes) * f32  # out + alphas output buffers (double-buffered)
    )
    weights = 2 * f32 * (sd * sq + sq * s_lanes + S * sd + sd * d_lanes + sq)
    est = tb * per_row + weights
    # 2x headroom; clamp to [32 MiB, 48 MiB]: >= scoped defaults on v6e/v7x,
    # <= v7x's 64 MiB physical VMEM (v5e/v6e have 128 MiB physical).
    return int(min(max(2 * est, 32 << 20), 48 << 20))


def attention_forward(x, w, b, vector, *, batch_tile=None):
    """x: (B, S, D); w: (D, Q); b: (Q,); vector: (Q,). Returns (output [B,D], alphas [B,S])."""
    B, S, D = x.shape
    Dw, Q = w.shape
    assert Dw == D

    tb = _choose_batch_tile(B) if batch_tile is None else batch_tile
    assert tb == B or tb % 8 == 0, "batch tile must equal B or be a multiple of 8"

    # Zero-pad the batch to a multiple of the tile so partial tiles never read
    # uninitialized VMEM (padded rows stay finite and are sliced off below).
    Bp = _round_up(B, tb)
    xp = x.reshape(B, S * D)             # contiguous -> free reshape, lane-dense rows
    if Bp != B:
        xp = jnp.pad(xp, ((0, Bp - B), (0, 0)))
    grid = (Bp // tb,)

    # Tiny pre-expanded block matrices so every kernel stage is a lane-dense matmul.
    f32 = jnp.float32
    wblk = jnp.kron(jnp.eye(S, dtype=f32), w.astype(f32)).astype(x.dtype)        # (S*D, S*Q)
    bblk = jnp.tile(b.astype(f32).reshape(1, Q), (1, S))                         # (1, S*Q)
    vblk = jnp.kron(jnp.eye(S, dtype=f32), vector.astype(f32).reshape(Q, 1))     # (S*Q, S)
    rrep = jnp.kron(jnp.eye(S, dtype=f32), jnp.ones((1, D), dtype=f32))          # (S, S*D)
    ksum = jnp.kron(jnp.ones((S, 1), dtype=f32), jnp.eye(D, dtype=f32))          # (S*D, D)

    out_shape = (
        jax.ShapeDtypeStruct((Bp, D), x.dtype),
        jax.ShapeDtypeStruct((Bp, S), x.dtype),
    )
    grid_spec = pltpu.PrefetchScalarGridSpec(
        num_scalar_prefetch=0,
        grid=grid,
        in_specs=[
            pl.BlockSpec((tb, S * D), lambda i: (i, 0)),
            pl.BlockSpec((S * D, S * Q), lambda i: (0, 0)),
            pl.BlockSpec((1, S * Q), lambda i: (0, 0)),
            pl.BlockSpec((S * Q, S), lambda i: (0, 0)),
            pl.BlockSpec((S, S * D), lambda i: (0, 0)),
            pl.BlockSpec((S * D, D), lambda i: (0, 0)),
        ],
        out_specs=[
            pl.BlockSpec((tb, D), lambda i: (i, 0)),
            pl.BlockSpec((tb, S), lambda i: (i, 0)),
        ],
    )

    itemsize = jnp.dtype(x.dtype).itemsize
    flops_per_row = (2 * (S * D * S * Q + S * Q * S + S * S * D + S * D * D)
                     + 3 * S * D + 4 * S)
    cost = pl.CostEstimate(
        flops=Bp * flops_per_row,
        transcendentals=Bp * S * (Q + 1),  # tanh + exp
        bytes_accessed=itemsize * (Bp * S * D + Bp * D + Bp * S)
        + 4 * (S * D * S * Q + S * Q * S + S * S * D + S * D * D + S * Q),
    )

    out, alphas = pl.pallas_call(
        _attention_kernel,
        out_shape=out_shape,
        grid_spec=grid_spec,
        cost_estimate=cost,
        compiler_params=pltpu.CompilerParams(
            dimension_semantics=("parallel",),
            vmem_limit_bytes=_vmem_limit_bytes(tb, S, D, Q, itemsize),
        ),
    )(xp, wblk, bblk, vblk, rrep, ksum)

    if Bp != B:
        out = out[:B]
        alphas = alphas[:B]
    return out, alphas


def attention_reference(x, w, b, vector):
    q = jnp.tanh(jnp.einsum("bsd,dq->bsq", x, w) + b)
    scores = jnp.einsum("bsq,q->bs", q, vector)
    alphas = jax.nn.softmax(scores, axis=-1)
    out = jnp.einsum("bs,bsd->bd", alphas, x)
    return out, alphas


if __name__ == "__main__":
    # Small shapes consistent with the module's forward:
    # batch=2, seq=8, input_dim=32, query_dim=16
    B, S, D, Q = 2, 8, 32, 16

    key = jax.random.PRNGKey(0)
    kx, kw, kb, kv = jax.random.split(key, 4)

    x = jax.random.normal(kx, (B, S, D), dtype=jnp.float32)
    w = jax.random.normal(kw, (D, Q), dtype=jnp.float32) * 0.1   # ffnn weight (input_dim -> query_dim)
    b = jax.random.normal(kb, (Q,), dtype=jnp.float32) * 0.1     # ffnn bias
    vector = jax.random.normal(kv, (Q,), dtype=jnp.float32)      # attention query vector

    # 1) Single grid step path (whole batch in one tile).
    out, alphas = attention_forward(x, w, b, vector)
    out = jax.block_until_ready(out)
    alphas = jax.block_until_ready(alphas)
    out_ref, alphas_ref = attention_reference(x, w, b, vector)
    assert out.shape == (B, D) and alphas.shape == (B, S)
    assert jnp.allclose(out, out_ref, atol=1e-5, rtol=1e-5)
    assert jnp.allclose(alphas, alphas_ref, atol=1e-5, rtol=1e-5)

    # 2) Multi-step tiled path (batch_tile=8, grid of 2 steps; v7x two-TC style grid).
    B2 = 16
    x2 = jax.random.normal(jax.random.PRNGKey(1), (B2, S, D), dtype=jnp.float32)
    out2, alphas2 = attention_forward(x2, w, b, vector, batch_tile=8)
    out2 = jax.block_until_ready(out2)
    alphas2 = jax.block_until_ready(alphas2)
    out2_ref, alphas2_ref = attention_reference(x2, w, b, vector)
    assert jnp.allclose(out2, out2_ref, atol=1e-5, rtol=1e-5)
    assert jnp.allclose(alphas2, alphas2_ref, atol=1e-5, rtol=1e-5)

    # 3) Partial-tile path (B=12 with tile 8 -> zero-padded to 16, outputs sliced back).
    B3 = 12
    x3 = jax.random.normal(jax.random.PRNGKey(2), (B3, S, D), dtype=jnp.float32)
    out3, alphas3 = attention_forward(x3, w, b, vector, batch_tile=8)
    out3 = jax.block_until_ready(out3)
    alphas3 = jax.block_until_ready(alphas3)
    out3_ref, alphas3_ref = attention_reference(x3, w, b, vector)
    assert out3.shape == (B3, D) and alphas3.shape == (B3, S)
    assert jnp.allclose(out3, out3_ref, atol=1e-5, rtol=1e-5)
    assert jnp.allclose(alphas3, alphas3_ref, atol=1e-5, rtol=1e-5)

    print("KERNEL_OK")
</pallas_src>

<mosaic_0001>
module attributes {stable_mosaic.version = 11 : i64} {
  func.func @_attention_kernel(%arg0: i32, %arg1: memref<2x256xf32, #tpu.memory_space<vmem>>, %arg2: memref<256x128xf32, #tpu.memory_space<vmem>>, %arg3: memref<1x128xf32, #tpu.memory_space<vmem>>, %arg4: memref<128x8xf32, #tpu.memory_space<vmem>>, %arg5: memref<8x256xf32, #tpu.memory_space<vmem>>, %arg6: memref<256x32xf32, #tpu.memory_space<vmem>>, %arg7: memref<2x32xf32, #tpu.memory_space<vmem>>, %arg8: memref<2x8xf32, #tpu.memory_space<vmem>>) attributes {dimension_semantics = [#tpu.dimension_semantics<parallel>], iteration_bounds = array<i64: 1>, scalar_prefetch = 0 : i64, scratch_operands = 0 : i64, tpu.core_type = #tpu.core_type<tc>, window_params = [{transform_indices = @transform_0, window_bounds = array<i64: 2, 256>}, {pipeline_mode = #tpu.pipeline_mode<synchronous>, transform_indices = @transform_1, window_bounds = array<i64: 256, 128>}, {pipeline_mode = #tpu.pipeline_mode<synchronous>, transform_indices = @transform_2, window_bounds = array<i64: 1, 128>}, {pipeline_mode = #tpu.pipeline_mode<synchronous>, transform_indices = @transform_3, window_bounds = array<i64: 128, 8>}, {pipeline_mode = #tpu.pipeline_mode<synchronous>, transform_indices = @transform_4, window_bounds = array<i64: 8, 256>}, {pipeline_mode = #tpu.pipeline_mode<synchronous>, transform_indices = @transform_5, window_bounds = array<i64: 256, 32>}, {transform_indices = @transform_6, window_bounds = array<i64: 2, 32>}, {transform_indices = @transform_7, window_bounds = array<i64: 2, 8>}]} {
    %c0 = arith.constant 0 : index
    %c0_0 = arith.constant 0 : index
    %0 = vector.load %arg1[%c0, %c0_0] : memref<2x256xf32, #tpu.memory_space<vmem>>, vector<2x256xf32>
    %c0_1 = arith.constant 0 : index
    %c0_2 = arith.constant 0 : index
    %1 = vector.load %arg2[%c0_1, %c0_2] : memref<256x128xf32, #tpu.memory_space<vmem>>, vector<256x128xf32>
    %cst = arith.constant dense<0.000000e+00> : vector<2x128xf32>
    %2 = tpu.matmul %0, %1, %cst {dimension_numbers = #tpu.dot_dimension_numbers<[1], [0], [0], [1], [0, 0, 1, 1], [], []>} : vector<2x256xf32>, vector<256x128xf32>, vector<2x128xf32> -> vector<2x128xf32>
    %c0_3 = arith.constant 0 : index
    %c0_4 = arith.constant 0 : index
    %3 = vector.load %arg3[%c0_3, %c0_4] : memref<1x128xf32, #tpu.memory_space<vmem>>, vector<1x128xf32>
    %4 = vector.broadcast %3 : vector<1x128xf32> to vector<2x128xf32>
    %5 = arith.addf %2, %4 : vector<2x128xf32>
    %6 = math.tanh %5 : vector<2x128xf32>
    %c0_5 = arith.constant 0 : index
    %c0_6 = arith.constant 0 : index
    %7 = vector.load %arg4[%c0_5, %c0_6] : memref<128x8xf32, #tpu.memory_space<vmem>>, vector<128x8xf32>
    %cst_7 = arith.constant dense<0.000000e+00> : vector<2x8xf32>
    %8 = tpu.matmul %6, %7, %cst_7 {dimension_numbers = #tpu.dot_dimension_numbers<[1], [0], [0], [1], [0, 0, 1, 1], [], []>} : vector<2x128xf32>, vector<128x8xf32>, vector<2x8xf32> -> vector<2x8xf32>
    %cst_8 = arith.constant dense<0xFF800000> : vector<2xf32>
    %9 = vector.multi_reduction <maximumf>, %8, %cst_8 [1] : vector<2x8xf32> to vector<2xf32>
    %10 = vector.shape_cast %9 : vector<2xf32> to vector<2x1xf32>
    %11 = vector.broadcast %10 : vector<2x1xf32> to vector<2x8xf32>
    %12 = arith.subf %8, %11 : vector<2x8xf32>
    %13 = math.exp %12 : vector<2x8xf32>
    %cst_9 = arith.constant dense<0.000000e+00> : vector<2xf32>
    %14 = vector.multi_reduction <add>, %13, %cst_9 [1] : vector<2x8xf32> to vector<2xf32>
    %15 = vector.shape_cast %14 : vector<2xf32> to vector<2x1xf32>
    %16 = tpu.reciprocal %15 : vector<2x1xf32> -> vector<2x1xf32>
    %17 = vector.broadcast %16 : vector<2x1xf32> to vector<2x8xf32>
    %18 = arith.mulf %13, %17 : vector<2x8xf32>
    %c0_10 = arith.constant 0 : index
    %c0_11 = arith.constant 0 : index
    %19 = vector.load %arg5[%c0_10, %c0_11] : memref<8x256xf32, #tpu.memory_space<vmem>>, vector<8x256xf32>
    %cst_12 = arith.constant dense<0.000000e+00> : vector<2x256xf32>
    %20 = tpu.matmul %18, %19, %cst_12 {dimension_numbers = #tpu.dot_dimension_numbers<[1], [0], [0], [1], [0, 0, 1, 1], [], []>} : vector<2x8xf32>, vector<8x256xf32>, vector<2x256xf32> -> vector<2x256xf32>
    %21 = arith.mulf %20, %0 : vector<2x256xf32>
    %c0_13 = arith.constant 0 : index
    %c0_14 = arith.constant 0 : index
    %22 = vector.load %arg6[%c0_13, %c0_14] : memref<256x32xf32, #tpu.memory_space<vmem>>, vector<256x32xf32>
    %cst_15 = arith.constant dense<0.000000e+00> : vector<2x32xf32>
    %23 = tpu.matmul %21, %22, %cst_15 {dimension_numbers = #tpu.dot_dimension_numbers<[1], [0], [0], [1], [0, 0, 1, 1], [], []>} : vector<2x256xf32>, vector<256x32xf32>, vector<2x32xf32> -> vector<2x32xf32>
    %c0_16 = arith.constant 0 : index
    %c0_17 = arith.constant 0 : index
    %24 = vector.load %arg7[%c0_16, %c0_17] : memref<2x32xf32, #tpu.memory_space<vmem>>, vector<2x32xf32>
    tpu.vector_store %arg7[%c0_16, %c0_17], %23 {strides = array<i32>} : memref<2x32xf32, #tpu.memory_space<vmem>>, vector<2x32xf32>,
    %c0_18 = arith.constant 0 : index
    %c0_19 = arith.constant 0 : index
    %25 = vector.load %arg8[%c0_18, %c0_19] : memref<2x8xf32, #tpu.memory_space<vmem>>, vector<2x8xf32>
    tpu.vector_store %arg8[%c0_18, %c0_19], %18 {strides = array<i32>} : memref<2x8xf32, #tpu.memory_space<vmem>>, vector<2x8xf32>,
    return
  }
  func.func @transform_0(%arg0: i32) -> (i32, i32) {
    %c0_i32 = arith.constant 0 : i32
    %c0_i32_0 = arith.constant 0 : i32
    return %arg0, %c0_i32 : i32, i32
  }
  func.func @transform_1(%arg0: i32) -> (i32, i32) {
    %c0_i32 = arith.constant 0 : i32
    %c0_i32_0 = arith.constant 0 : i32
    %c0_i32_1 = arith.constant 0 : i32
    return %c0_i32, %c0_i32_0 : i32, i32
  }
  func.func @transform_2(%arg0: i32) -> (i32, i32) {
    %c0_i32 = arith.constant 0 : i32
    %c0_i32_0 = arith.constant 0 : i32
    %c0_i32_1 = arith.constant 0 : i32
    return %c0_i32, %c0_i32_0 : i32, i32
  }
  func.func @transform_3(%arg0: i32) -> (i32, i32) {
    %c0_i32 = arith.constant 0 : i32
    %c0_i32_0 = arith.constant 0 : i32
    %c0_i32_1 = arith.constant 0 : i32
    return %c0_i32, %c0_i32_0 : i32, i32
  }
  func.func @transform_4(%arg0: i32) -> (i32, i32) {
    %c0_i32 = arith.constant 0 : i32
    %c0_i32_0 = arith.constant 0 : i32
    %c0_i32_1 = arith.constant 0 : i32
    return %c0_i32, %c0_i32_0 : i32, i32
  }
  func.func @transform_5(%arg0: i32) -> (i32, i32) {
    %c0_i32 = arith.constant 0 : i32
    %c0_i32_0 = arith.constant 0 : i32
    %c0_i32_1 = arith.constant 0 : i32
    return %c0_i32, %c0_i32_0 : i32, i32
  }
  func.func @transform_6(%arg0: i32) -> (i32, i32) {
    %c0_i32 = arith.constant 0 : i32
    %c0_i32_0 = arith.constant 0 : i32
    return %arg0, %c0_i32 : i32, i32
  }
  func.func @transform_7(%arg0: i32) -> (i32, i32) {
    %c0_i32 = arith.constant 0 : i32
    %c0_i32_0 = arith.constant 0 : i32
    return %arg0, %c0_i32 : i32, i32
  }
}

</mosaic_0001>

<bundles_post_ra>
// kernel: tpu_custom_call.1
= control target key start
LH: loop header
LB: loop body
LE: loop exit
PB: predicated region body
PF: predicated region fallthrough
CT: control target
= control target key end

     0   :  { %13 = vsyncpa [#allocation3], 0  ;;  %s698_s0 = inlined_call_operand.vmem [shape: f32[2,256], index: 0, kind: input, shape index: {}]   ;;  %s699_s1 = inlined_call_operand.vmem [shape: f32[256,128], index: 1, kind: input, shape index: {}]   ;;  %s700_s2 = inlined_call_operand.vmem [shape: f32[1,128], index: 2, kind: input, shape index: {}]   ;;  %s701_s3 = inlined_call_operand.vmem [shape: f32[128,8], index: 3, kind: input, shape index: {}]   ;;  %s702_s4 = inlined_call_operand.vmem [shape: f32[8,256], index: 4, kind: input, shape index: {}]   ;;  %s703_s5 = inlined_call_operand.vmem [shape: f32[256,32], index: 5, kind: input, shape index: {}]   ;;  %s704_s6 = inlined_call_operand.hbm [shape: f32[2,32], index: 6, kind: output, shape index: {0}]   ;;  %s705_s7 = inlined_call_operand.hbm [shape: f32[2,8], index: 7, kind: output, shape index: {1}]  }
   0x1   :  { %v43_v0 = vld [vmem:[%s699_s1 + $0x78] sm:$0xff]  ;;  %v42_v1 = vld [vmem:[%s699_s1 + $0x70] sm:$0xff]  ;;  %v41_v4 = vld [vmem:[%s699_s1 + $0x68] sm:$0xff] }
   0x2   :  { %v59_v2 = vld [vmem:[%s699_s1 + $0xf8] sm:$0xff]  ;;  %70 = vmatpush.msra.mxu0 %v43_v0  ;;  %v58_v3 = vld [vmem:[%s699_s1 + $0xf0] sm:$0xff]  ;;  %v57_v5 = vld [vmem:[%s699_s1 + $0xe8] sm:$0xff] }
   0x3   :  { %90 = vmatpush.msra.mxu1 %v59_v2  ;;  %v40_v6 = vld [vmem:[%s699_s1 + $0x60] sm:$0xff]  ;;  %v39_v8 = vld [vmem:[%s699_s1 + $0x58] sm:$0xff]  ;;  %v38_v10 = vld [vmem:[%s699_s1 + $0x50] sm:$0xff] }
   0x4   :  { %71 = vmatpush.msra.mxu0 %v42_v1  ;;  %v56_v7 = vld [vmem:[%s699_s1 + $0xe0] sm:$0xff]  ;;  %v55_v9 = vld [vmem:[%s699_s1 + $0xd8] sm:$0xff]  ;;  %v54_v11 = vld [vmem:[%s699_s1 + $0xd0] sm:$0xff] }
   0x5   :  { %91 = vmatpush.msra.mxu1 %v58_v3  ;;  %v37_v12 = vld [vmem:[%s699_s1 + $0x48] sm:$0xff]  ;;  %v27_v14 = vld [vmem:[%s698_s0] sm:$0xf]  ;;  %v126_v15 = vld [vmem:[%s701_s3 + $0x78] sm:$0xff] }
   0x6   :  { %72 = vmatpush.msra.mxu0 %v41_v4  ;;  %v53_v13 = vld [vmem:[%s699_s1 + $0xc8] sm:$0xff]  ;;  %65 = vst [vmem:[#allocation1] ss:$4 sm:$0xff] %v27_v14  ;;  %v125_v16 = vld [vmem:[%s701_s3 + $0x70] sm:$0xff]  ;;  %v36_v17 = vld [vmem:[%s699_s1 + $0x40] sm:$0xff]  ;;  %127 = vmatpush.msra.mxu2 %v126_v15 }
   0x7   :  { %92 = vmatpush.msra.mxu1 %v57_v5  ;;  %v52_v18 = vld [vmem:[%s699_s1 + $0xc0] sm:$0xff]  ;;  %v124_v19 = vld [vmem:[%s701_s3 + $0x68] sm:$0xff]  ;;  %v35_v20 = vld [vmem:[%s699_s1 + $0x38] sm:$0xff] }
   0x8   :  { %73 = vmatpush.msra.mxu0 %v40_v6  ;;  %v51_v21 = vld [vmem:[%s699_s1 + $0xb8] sm:$0xff]  ;;  %128 = vmatpush.msra.mxu2 %v125_v16  ;;  %v123_v22 = vld [vmem:[%s701_s3 + $0x60] sm:$0xff] }
   0x9   :  { %93 = vmatpush.msra.mxu1 %v56_v7 }
   0xa   :  { %74 = vmatpush.msra.mxu0 %v39_v8 }
   0xb   :  { %94 = vmatpush.msra.mxu1 %v55_v9 }
   0xc   :  { %75 = vmatpush.msra.mxu0 %v38_v10 }
   0xd   :  { %95 = vmatpush.msra.mxu1 %v54_v11 }
   0xe   :  { %76 = vmatpush.msra.mxu0 %v37_v12 }
   0xf   :  { %96 = vmatpush.msra.mxu1 %v53_v13 }
  0x10   :  { %77 = vmatpush.msra.mxu0 %v36_v17 }
  0x11   :  { %97 = vmatpush.msra.mxu1 %v52_v18 }
  0x12   :  { %14 = vsyncpa [#allocation5], 0  ;;  %v34_v23 = vld [vmem:[%s699_s1 + $0x30] sm:$0xff]  ;;  %129 = vmatpush.msra.mxu2 %v124_v19  ;;  %78 = vmatpush.msra.mxu0 %v35_v20  ;;  %v33_v25 = vld [vmem:[%s699_s1 + $0x28] sm:$0xff]  ;;  %vm147_vm0 = vcmask 58368   ;;  %vm174_vm5 = vcmask 64512  }
  0x13   :  { %v50_v24 = vld [vmem:[%s699_s1 + $0xb0] sm:$0xff]  ;;  %98 = vmatpush.msra.mxu1 %v51_v21  ;;  %v49_v26 = vld [vmem:[%s699_s1 + $0xa8] sm:$0xff]  ;;  %v122_v27 = vld [vmem:[%s701_s3 + $0x58] sm:$0xff]  ;;  %s395_s14 = smov [#allocation4]   ;;  %s318_s17 = sshll.u32 %s705_s7, 4  ;;  %vm297_vm6 = vcmask 254976   ;;  %s319_s17 = int_to_ptr.hbm [resolvable:$true] %s318_s17 }
  0x14   :  { %v66_v28 = vld.sshfl [vmem:[#allocation1] sm:$0xff pattern:$0x73625140]  ;;  %v67_v29 = vld.sshfl [vmem:[#allocation1 + $0x8] sm:$0xff pattern:$0x73625140]  ;;  %130 = vmatpush.msra.mxu2 %v123_v22  ;;  %79 = vmatpush.msra.mxu0 %v34_v23 }
  0x15   :  { %99 = vmatpush.msra.mxu1 %v50_v24  ;;  %218 = vst [vmem:[#allocation1] ss:$4 sm:$0xff] %v27_v14  ;;  %v121_v30 = vld [vmem:[%s701_s3 + $0x50] sm:$0xff]  ;;  %v32_v31 = vld [vmem:[%s699_s1 + $0x20] sm:$0xff]  ;;  %v120_v33 = vld [vmem:[%s701_s3 + $0x48] sm:$0xff]  ;;  %s316_s15 = sshll.u32 %s395_s14, 4  ;;  %s317_s15 = int_to_ptr.vmem [resolvable:$true] %s316_s15 }
  0x16   :  { %v48_v32 = vld [vmem:[%s699_s1 + $0xa0] sm:$0xff]  ;;  %131 = vmatpush.msra.mxu2 %v122_v27  ;;  %80 = vmatpush.msra.mxu0 %v33_v25  ;;  %v31_v34 = vld [vmem:[%s699_s1 + $0x18] sm:$0xff]  ;;  %v30_v37 = vld [vmem:[%s699_s1 + $0x10] sm:$0xff]  ;;  %s396_s18 = smov [#allocation2]   ;;  %s307_s20 = sshll.u32 %s704_s6, 4  ;;  %s308_s20 = int_to_ptr.hbm [resolvable:$true] %s307_s20 }
  0x17   :  { %100 = vmatpush.msra.mxu1 %v49_v26  ;;  %v47_v35 = vld [vmem:[%s699_s1 + $0x98] sm:$0xff]  ;;  %v119_v36 = vld [vmem:[%s701_s3 + $0x40] sm:$0xff]  ;;  %v46_v38 = vld [vmem:[%s699_s1 + $0x90] sm:$0xff] }
  0x18   :  { %132 = vmatpush.msra.mxu2 %v121_v30  ;;  %81 = vmatpush.msra.mxu0 %v32_v31  ;;  %v118_v39 = vld [vmem:[%s701_s3 + $0x38] sm:$0xff]  ;;  %v29_v40 = vld [vmem:[%s699_s1 + $0x8] sm:$0xff]  ;;  %v117_v42 = vld [vmem:[%s701_s3 + $0x30] sm:$0xff] }
  0x19   :  { %101 = vmatpush.msra.mxu1 %v48_v32  ;;  %v45_v41 = vld [vmem:[%s699_s1 + $0x88] sm:$0xff]  ;;  %v28_v43 = vld [vmem:[%s699_s1] sm:$0xff]  ;;  %v114_v47 = vld [vmem:[%s701_s3 + $0x18] sm:$0xff] }
  0x1a   :  { %133 = vmatpush.msra.mxu2 %v120_v33  ;;  %82 = vmatpush.msra.mxu0 %v31_v34  ;;  %v44_v44 = vld [vmem:[%s699_s1 + $0x80] sm:$0xff]  ;;  %v116_v45 = vld [vmem:[%s701_s3 + $0x28] sm:$0xff]  ;;  %v113_v48 = vld [vmem:[%s701_s3 + $0x10] sm:$0xff] }
  0x1b   :  { %102 = vmatpush.msra.mxu1 %v47_v35  ;;  %v115_v46 = vld [vmem:[%s701_s3 + $0x20] sm:$0xff]  ;;  %v112_v49 = vld [vmem:[%s701_s3 + $0x8] sm:$0xff]  ;;  %v256_v2 = vld [vmem:[%s703_s5 + $0xf8] sm:$0xff] }
  0x1c   :  { %134 = vmatpush.msra.mxu2 %v119_v36  ;;  %83 = vmatpush.msra.mxu0 %v30_v37  ;;  %v111_v50 = vld [vmem:[%s701_s3] sm:$0xff]  ;;  %v173_v1 = vld [vmem:[%s702_s4 + $0x8] sm:$0xff]  ;;  %v255_v3 = vld [vmem:[%s703_s5 + $0xf0] sm:$0xff] }
  0x1d   :  { %103 = vmatpush.msra.mxu1 %v46_v38  ;;  %v336_v51 = vld [vmem:[%s700_s2] ss:$0 sm:$0xff]  ;;  %v254_v5 = vld [vmem:[%s703_s5 + $0xe8] sm:$0xff]  ;;  %v252_v7 = vld [vmem:[%s703_s5 + $0xd8] sm:$0xff] }
  0x1e   :  { %135 = vmatpush.msra.mxu2 %v118_v39  ;;  %84 = vmatpush.msra.mxu0 %v29_v40  ;;  %v172_v0 = vld [vmem:[%s702_s4] sm:$0xff]  ;;  %v251_v9 = vld [vmem:[%s703_s5 + $0xd0] sm:$0xff]  ;;  %v250_v11 = vld [vmem:[%s703_s5 + $0xc8] sm:$0xff] }
  0x1f   :  { %104 = vmatpush.msra.mxu1 %v45_v41  ;;  %193 = vmatpush.msra.mxu3 %v172_v0  ;;  %v253_v6 = vld [vmem:[%s703_s5 + $0xe0] sm:$0xff]  ;;  %v248_v17 = vld [vmem:[%s703_s5 + $0xb8] sm:$0xff]  ;;  %v247_v20 = vld [vmem:[%s703_s5 + $0xb0] sm:$0xff] }
  0x20   :  { %136 = vmatpush.msra.mxu2 %v117_v42  ;;  %85 = vmatpush.msra.mxu0 %v28_v43  ;;  %v249_v14 = vld [vmem:[%s703_s5 + $0xc0] sm:$0xff]  ;;  %v240_v24 = vld [vmem:[%s703_s5 + $0x78] sm:$0xff]  ;;  %v239_v25 = vld [vmem:[%s703_s5 + $0x70] sm:$0xff] }
  0x21   :  { %105 = vmatpush.msra.mxu1 %v44_v44  ;;  %86 = vmatmul.f32.vlgmr.msra.gmra.mxu0 %v66_v28  ;;  %v238_v26 = vld [vmem:[%s703_s5 + $0x68] sm:$0xff]  ;;  %v237_v27 = vld [vmem:[%s703_s5 + $0x60] sm:$0xff]  ;;  %v236_v28 = vld [vmem:[%s703_s5 + $0x58] sm:$0xff] }
  0x22   :  { %106 = vmatmul.f32.vlgmr.msra.gmra.mxu1 %v67_v29  ;;  %137 = vmatpush.msra.mxu2 %v116_v45  ;;  %v235_v29 = vld [vmem:[%s703_s5 + $0x50] sm:$0xff]  ;;  %v234_v30 = vld [vmem:[%s703_s5 + $0x48] sm:$0xff]  ;;  %v233_v31 = vld [vmem:[%s703_s5 + $0x40] sm:$0xff] }
  0x23   :  { %213 = vmatpush.msrb.mxu3 %v173_v1  ;;  %277 = vmatpush.msrb.mxu0 %v256_v2  ;;  %v232_v32 = vld [vmem:[%s703_s5 + $0x38] sm:$0xff]  ;;  %v231_v33 = vld [vmem:[%s703_s5 + $0x30] sm:$0xff]  ;;  %v230_v34 = vld [vmem:[%s703_s5 + $0x28] sm:$0xff] }
  0x24   :  { %138 = vmatpush.msra.mxu2 %v115_v46  ;;  %v229_v35 = vld [vmem:[%s703_s5 + $0x20] sm:$0xff]  ;;  %v228_v36 = vld [vmem:[%s703_s5 + $0x18] sm:$0xff]  ;;  %v227_v37 = vld [vmem:[%s703_s5 + $0x10] sm:$0xff] }
  0x25   :  { %278 = vmatpush.msrb.mxu0 %v255_v3  ;;  %v226_v38 = vld [vmem:[%s703_s5 + $0x8] sm:$0xff]  ;;  %v225_v40 = vld [vmem:[%s703_s5] sm:$0xff]  ;;  %v244_v42 = vld [vmem:[%s703_s5 + $0x98] sm:$0xff] }
  0x26   :  { %139 = vmatpush.msra.mxu2 %v114_v47  ;;  %v246_v39 = vld [vmem:[%s703_s5 + $0xa8] sm:$0xff]  ;;  %v245_v41 = vld [vmem:[%s703_s5 + $0xa0] sm:$0xff]  ;;  %v243_v43 = vld [vmem:[%s703_s5 + $0x90] sm:$0xff] }
  0x27   :  { %279 = vmatpush.msrb.mxu0 %v254_v5  ;;  %v242_v44 = vld [vmem:[%s703_s5 + $0x88] sm:$0xff]  ;;  %v241_v45 = vld [vmem:[%s703_s5 + $0x80] sm:$0xff]  ;;  %s305_s5 = sshll.u32 %s396_s18, 4  ;;  %s306_s5 = int_to_ptr.vmem [resolvable:$true] %s305_s5 }
  0x28   :  { %140 = vmatpush.msra.mxu2 %v113_v48  ;;  %v219_v46 = vld.sshfl [vmem:[#allocation1] sm:$0xff pattern:$0x73625140] }
  0x29   :  { %280 = vmatpush.msrb.mxu0 %v253_v6 }
  0x2a   :  { %141 = vmatpush.msra.mxu2 %v112_v49  ;;  %v220_v49 = vld.sshfl [vmem:[#allocation1 + $0x8] sm:$0xff pattern:$0x73625140] }
  0x2b   :  { %281 = vmatpush.msrb.mxu0 %v252_v7 }
  0x2c   :  { %142 = vmatpush.msra.mxu2 %v111_v50 }
  0x2d   :  { %282 = vmatpush.msrb.mxu0 %v251_v9 }
  0x2f   :  { %283 = vmatpush.msrb.mxu0 %v250_v11 }
  0x31   :  { %284 = vmatpush.msrb.mxu0 %v249_v14 }
  0x33   :  { %285 = vmatpush.msrb.mxu0 %v248_v17 }
  0x35   :  { %286 = vmatpush.msrb.mxu0 %v247_v20 }
  0x37   :  { %287 = vmatpush.msrb.mxu0 %v246_v39 }
  0x39   :  { %288 = vmatpush.msrb.mxu0 %v245_v41 }
  0x3b   :  { %289 = vmatpush.msrb.mxu0 %v244_v42 }
  0x3d   :  { %290 = vmatpush.msrb.mxu0 %v243_v43 }
  0x3f   :  { %291 = vmatpush.msrb.mxu0 %v242_v44 }
  0x41   :  { %292 = vmatpush.msrb.mxu0 %v241_v45 }
  0x9e   :  { %v87_v52 = vpop.f32.mrf.mxu0 }
  0x9f   :  { %v107_v53 = vpop.f32.mrf.mxu1  ;;  %v88_v54 = vadd.f32 %v336_v51, %v87_v52 }
  0xa1   :  { %v108_v55 = vadd.f32 %v107_v53, %v88_v54 }
  0xa3   :  { %337 = vtanh.f32 %v108_v55 }
  0xa9   :  { %v338_v56 = vpop.eup %337 }
  0xaa   :  { %143 = vmatmul.f32.vlgmr.msra.gmra.mxu2 %v338_v56 }
 0x12d   :  { %v144_v57 = vpop.f32.mrf.mxu2 }
 0x12e   :  { %v148_v58 = vsel %vm147_vm0, %v144_v57, -inf }
 0x12f   :  { %149 = vmax.xlane.f32.xlu0 %v148_v58 }
 0x1a2   :  { %v150_v59 = vpop.xlane.xlu0 %149 }
 0x1a3   :  { %v151_v60 = vsub.f32 %v144_v57, %v150_v59 }
 0x1a5   :  { %v152_v61 = vmul.f32 1.442695, %v151_v60 }
 0x1a7   :  { %339 = vpow2.f32 %v152_v61 }
 0x1ad   :  { %v340_v62 = vpop.eup %339 }
 0x1ae   :  { %v154_v63 = vsel %vm147_vm0, %v340_v62, 0.0 }
 0x1af   :  { %155 = vadd.xlane.f32.xlu0 %v154_v63 }
 0x222   :  { %v156_v4 = vpop.xlane.xlu0 %155 }
 0x223   :  { %341 = vrcp.f32 %v156_v4  ;;  %v168_v13 = vand.u32 2147483648, %v156_v4  ;;  %v166_v16 = vand.u32 2147483647, %v156_v4  ;;  %vm162_vm2 = vweird.f32 %v156_v4 }
 0x225   :  { %v169_v19 = vor.u32 1.1754944e-38, %v168_v13  ;;  %vm167_vm4 = vcmp.eq.f32.partialorder %v166_v16, 8.507059e+37 }
 0x229   :  { %v342_v8 = vpop.eup %341 }
 0x22a   :  { %v158_v10 = vmul.f32 %v342_v8, %v156_v4  ;;  %vm163_vm1 = vweird.f32 %v342_v8 }
 0x22b   :  { %vm164_vm3 = vmor %vm162_vm2, %vm163_vm1 }
 0x22c   :  { %v159_v12 = vsub.f32 1.0, %v158_v10 }
 0x22e   :  { %v160_v15 = vmul.f32 %v342_v8, %v159_v12 }
 0x230   :  { %v161_v18 = vadd.f32 %v342_v8, %v160_v15 }
 0x232   :  { %v165_v21 = vsel %vm164_vm3, %v342_v8, %v161_v18 }
 0x233   :  { %v170_v22 = vsel %vm167_vm4, %v169_v19, %v165_v21 }
 0x234   :  { %v171_v23 = vmul.f32 %v340_v62, %v170_v22 }
 0x236   :  { %332 = vmatmul.msk.f32.vlgmr.msra.gmra.mxu3 %vm174_vm5, %v171_v23  ;;  %299 = vst.msk [vmem:[#allocation4] sm:$0x3] %vm147_vm0, %v171_v23 }
 0x237   :  { %257 = vmatpush.msra.mxu3 %v240_v24  ;;  %321 = dma.vmem_to_hbm [thread:$0]  %s317_s15, 32, %s319_s17, [#allocation5]  }
 0x239   :  { %258 = vmatpush.msra.mxu3 %v239_v25 }
 0x23b   :  { %259 = vmatpush.msra.mxu3 %v238_v26 }
 0x23d   :  { %260 = vmatpush.msra.mxu3 %v237_v27 }
 0x23e   :  { %333 = vmatmul.msk.f32.vlgmr.msrb.gmra.mxu3 %vm174_vm5, %v171_v23 }
 0x23f   :  { %261 = vmatpush.msra.mxu3 %v236_v28 }
 0x241   :  { %262 = vmatpush.msra.mxu3 %v235_v29 }
 0x243   :  { %263 = vmatpush.msra.mxu3 %v234_v30 }
 0x245   :  { %264 = vmatpush.msra.mxu3 %v233_v31 }
 0x247   :  { %265 = vmatpush.msra.mxu3 %v232_v32 }
 0x249   :  { %266 = vmatpush.msra.mxu3 %v231_v33 }
 0x24b   :  { %267 = vmatpush.msra.mxu3 %v230_v34 }
 0x24d   :  { %268 = vmatpush.msra.mxu3 %v229_v35 }
 0x24f   :  { %269 = vmatpush.msra.mxu3 %v228_v36 }
 0x251   :  { %270 = vmatpush.msra.mxu3 %v227_v37 }
 0x253   :  { %271 = vmatpush.msra.mxu3 %v226_v38 }
 0x255   :  { %272 = vmatpush.msra.mxu3 %v225_v40 }
 0x2b9   :  { %v195_v47 = vpop.f32.mrf.mxu3 }
 0x2ba   :  { %v223_v48 = vmul.f32 %v219_v46, %v195_v47 }
 0x2bc   :  { %273 = vmatmul.f32.vlgmr.msra.gmra.mxu3 %v223_v48 }
 0x2c1   :  { %v215_v50 = vpop.f32.mrf.mxu3 }
 0x2c2   :  { %v224_v51 = vmul.f32 %v220_v49, %v215_v50 }
 0x2c4   :  { %293 = vmatmul.f32.vlgmr.msrb.gmra.mxu0 %v224_v51 }
 0x33f   :  { %v274_v52 = vpop.f32.mrf.mxu3 }
 0x341   :  { %v294_v53 = vpop.f32.mrf.mxu0 }
 0x342   :  { %v295_v54 = vadd.f32 %v294_v53, %v274_v52 }
 0x344   :  { %298 = vst.msk [vmem:[#allocation2] sm:$0x3] %vm297_vm6, %v295_v54 }
 0x345   :  { %310 = dma.vmem_to_hbm [thread:$0]  %s306_s5, 32, %s308_s20, [#allocation3]  }
 0x346   :  { %391 = dma.done.wait [#allocation3], 32  }
 0x347   :  { %392 = vsyncadd [#allocation3], 4294967264 }
 0x348   :  { %393 = dma.done.wait [#allocation5], 32  }
 0x349   :  { %394 = vsyncadd [#allocation5], 4294967264 }
 0x34a   :  { %330 = vsyncpa [#allocation3], 1 }
 0x34b   :  { %331 = vsyncpa [#allocation5], 1 }

</bundles_post_ra>
